<compile_context>
chip_gen: v7x
topology: tpu7x:2x2x1
jax: 0.10.0
libtpu: 0.0.40
codegen_flags: <defaults>
</compile_context>

<pallas_src>
import functools

import jax
import jax.numpy as jnp
from jax.experimental import pallas as pl
from jax.experimental.pallas import tpu as pltpu


def _self_attention_kernel(v_ref, k_ref, q_ref,
                           wv_ref, wk_ref, wq_ref, wo_ref, bo_ref,
                           o_ref, *, batch_block, q_len, kv_len):
    h = pl.program_id(1)
    bb, Lq, Lk = batch_block, q_len, kv_len
    D = wq_ref.shape[-1]

    # Per-head weight slabs: dynamic leading-axis index on resident VMEM refs
    # (no lane-axis slicing).  Wq already carries the 1/sqrt(E) scale.
    wq = wq_ref[h]                      # (E, D) bf16
    wk = wk_ref[h]                      # (E, D) bf16
    wv = wv_ref[h]                      # (E, D) bf16
    wo = wo_ref[h]                      # (D, E) bf16

    # Projections for this head: plain x @ W (weights pre-transposed), bf16
    # operands, f32 accumulation.
    Q = jnp.dot(q_ref[...], wq, preferred_element_type=jnp.float32)   # (bb*Lq, D)
    K = jnp.dot(k_ref[...], wk, preferred_element_type=jnp.float32)   # (bb*Lk, D)
    V = jnp.dot(v_ref[...], wv, preferred_element_type=jnp.float32)   # (bb*Lk, D)

    Qb = Q.astype(jnp.bfloat16).reshape(bb, Lq, D)
    Kb = K.astype(jnp.bfloat16).reshape(bb, Lk, D)
    Vb = V.astype(jnp.bfloat16).reshape(bb, Lk, D)

    # Attention for this head, batched over the bb batch elements in the block.
    # TODO(synk): for long sequences, tile Lk here with an online (flash-style)
    # softmax so the (bb, Lq, Lk) f32 scores stay within v7x's 32 MiB scope.
    energy = jnp.einsum('bqd,bkd->bqk', Qb, Kb,
                        preferred_element_type=jnp.float32)            # (bb,Lq,Lk)
    m = jnp.max(energy, axis=-1, keepdims=True)
    p = jnp.exp(energy - m)
    attn = p * pl.reciprocal(jnp.sum(p, axis=-1, keepdims=True), approx=True)

    ctx = jnp.einsum('bqk,bkd->bqd', attn.astype(jnp.bfloat16), Vb,
                     preferred_element_type=jnp.float32)               # (bb,Lq,D)
    ctx2 = ctx.astype(jnp.bfloat16).reshape(bb * Lq, D)

    # Per-head slice of the output projection, accumulated into the resident
    # f32 output block across the head grid axis.
    contrib = jnp.dot(ctx2, wo, preferred_element_type=jnp.float32)    # (bb*Lq, E)

    @pl.when(h == 0)
    def _():
        o_ref[...] = contrib + bo_ref[...]

    @pl.when(h != 0)
    def _():
        o_ref[...] += contrib


def _vmem_budget_bytes(default_bytes=32 * 1024 * 1024):
    """Scoped-VMEM budget used both for block sizing and the compiler limit."""
    try:
        cap = getattr(pltpu.get_tpu_info(), "vmem_capacity_bytes", None)
        if cap:
            return (int(cap) * 3) // 4          # headroom below physical VMEM
    except Exception:
        pass
    return default_bytes


def _step_vmem_bytes(bb, lq, lk, e, heads):
    """Rough per-grid-step VMEM footprint for a given batch block."""
    d = e // heads
    acts = 2 * bb * (lq + 2 * lk) * e * 2       # double-buffered bf16 q/k/v blocks
    outs = 2 * bb * lq * e * 4                  # double-buffered f32 output block
    weights = 4 * e * e * 2 + 4 * e             # resident bf16 weights + f32 bias
    scores = 2 * bb * lq * lk * 4               # energy + attn (one head at a time)
    head_io = bb * (lq + 2 * lk) * d * 4 + bb * lq * e * 4
    return acts + outs + weights + scores + head_io


def _pick_batch_block(n, lq, lk, e, heads, vmem_budget, target_rows=512):
    """Pick bb so bb*Lq reaches an MXU-friendly row count, fits VMEM, and keeps
    >= 2 batch grid steps when possible (the head axis adds heads more steps)."""
    divisors = [d for d in range(1, n + 1) if n % d == 0]
    fitting = [d for d in divisors
               if _step_vmem_bytes(d, lq, lk, e, heads) <= vmem_budget]
    if not fitting:
        return 1
    multi = [d for d in fitting if n // d >= 2] or fitting
    for d in multi:
        if d * lq >= target_rows:
            return d
    return multi[-1]
    # TODO(synk): pad N (and L to sublane/lane multiples) instead of falling
    # back to small blocks when N has awkward divisors.


def self_attention(value, key, query, wv, wk, wq, wo, bo, *, heads,
                   batch_block=None):
    N, Lv, E = value.shape
    _, Lk, _ = key.shape
    _, Lq, _ = query.shape
    D = E // heads
    assert D * heads == E, "embed_size must be divisible by heads"
    assert Lv == Lk, "attention needs value_len == key_len"

    vmem_budget = _vmem_budget_bytes()
    bb = batch_block if batch_block is not None else _pick_batch_block(
        N, Lq, Lk, E, heads, vmem_budget)
    assert N % bb == 0

    f32, bf16 = jnp.float32, jnp.bfloat16
    scale = 1.0 / (float(E) ** 0.5)     # torch scales by sqrt(embed_size)

    # Lane-dense 2-D row presentation: the grid blocks rows, no in-kernel
    # ref reshapes.
    v2d = value.reshape(N * Lv, E).astype(bf16)
    k2d = key.reshape(N * Lk, E).astype(bf16)
    q2d = query.reshape(N * Lq, E).astype(bf16)

    # PyTorch Linear weights are (out, in); pre-transpose to "x @ W" layout and
    # pre-split per head so the kernel never slices the lane axis.
    def _split_in_out(w, s=1.0):
        w_t = (w.astype(f32) * s).T                               # (E_in, E_out)
        return w_t.reshape(E, heads, D).transpose(1, 0, 2).astype(bf16)  # (H,E,D)

    wq_h = _split_in_out(wq, scale)                  # 1/sqrt(E) folded into Wq
    wk_h = _split_in_out(wk)
    wv_h = _split_in_out(wv)
    wo_h = wo.astype(f32).T.reshape(heads, D, E).astype(bf16)     # (H, D, E)
    bo2d = bo.reshape(1, E).astype(f32)

    kernel = functools.partial(_self_attention_kernel,
                               batch_block=bb, q_len=Lq, kv_len=Lk)

    grid_spec = pltpu.PrefetchScalarGridSpec(
        num_scalar_prefetch=0,
        grid=(N // bb, heads),
        in_specs=[
            pl.BlockSpec((bb * Lv, E), lambda n, h: (n, 0)),      # value rows
            pl.BlockSpec((bb * Lk, E), lambda n, h: (n, 0)),      # key rows
            pl.BlockSpec((bb * Lq, E), lambda n, h: (n, 0)),      # query rows
            pl.BlockSpec(memory_space=pltpu.MemorySpace.VMEM),    # Wv (H,E,D)
            pl.BlockSpec(memory_space=pltpu.MemorySpace.VMEM),    # Wk (H,E,D)
            pl.BlockSpec(memory_space=pltpu.MemorySpace.VMEM),    # Wq (H,E,D)
            pl.BlockSpec(memory_space=pltpu.MemorySpace.VMEM),    # Wo (H,D,E)
            pl.BlockSpec(memory_space=pltpu.MemorySpace.VMEM),    # bias (1,E)
        ],
        out_specs=pl.BlockSpec((bb * Lq, E), lambda n, h: (n, 0)),
    )

    out2d = pl.pallas_call(
        kernel,
        # TODO(synk): expose a bf16 output option to halve writeback when the
        # consumer does not need f32.
        out_shape=jax.ShapeDtypeStruct((N * Lq, E), jnp.float32),
        grid_spec=grid_spec,
        compiler_params=pltpu.CompilerParams(
            dimension_semantics=("parallel", "arbitrary"),
            vmem_limit_bytes=int(vmem_budget),
        ),
    )(v2d, k2d, q2d, wv_h, wk_h, wq_h, wo_h, bo2d)
    return out2d.reshape(N, Lq, E)


def _reference(value, key, query, wv, wk, wq, wo, bo, *, heads):
    N, Lq, E = query.shape
    D = E // heads
    V = (value @ wv.T).reshape(N, -1, heads, D)
    K = (key @ wk.T).reshape(N, -1, heads, D)
    Q = (query @ wq.T).reshape(N, -1, heads, D)
    energy = jnp.einsum('nqhd,nkhd->nhqk', Q, K)
    attn = jax.nn.softmax(energy / (E ** 0.5), axis=3)
    out = jnp.einsum('nhql,nlhd->nqhd', attn, V).reshape(N, Lq, E)
    return out @ wo.T + bo.reshape(1, 1, E)


if __name__ == "__main__":
    N, L, E, H = 2, 8, 32, 4   # batch, seq_len, embed_size, heads

    key0 = jax.random.PRNGKey(0)
    ks = jax.random.split(key0, 8)
    value = jax.random.normal(ks[0], (N, L, E), jnp.float32)
    keyx  = jax.random.normal(ks[1], (N, L, E), jnp.float32)
    query = jax.random.normal(ks[2], (N, L, E), jnp.float32)

    # Deterministic parameters (PyTorch Linear layout: (out_features, in_features)).
    wv = jax.random.normal(ks[3], (E, E), jnp.float32) * 0.1
    wk = jax.random.normal(ks[4], (E, E), jnp.float32) * 0.1
    wq = jax.random.normal(ks[5], (E, E), jnp.float32) * 0.1
    wo = jax.random.normal(ks[6], (E, E), jnp.float32) * 0.1
    bo = jax.random.normal(ks[7], (1, E), jnp.float32) * 0.1

    out = self_attention(value, keyx, query, wv, wk, wq, wo, bo, heads=H)
    out = jax.block_until_ready(out)

    ref = _reference(value, keyx, query, wv, wk, wq, wo, bo, heads=H)
    # Tolerance reflects bf16 MXU operands + approximate (EUP) reciprocal in
    # the softmax normalization; accumulation is f32.
    assert jnp.allclose(out, ref, atol=3e-2, rtol=3e-2), "mismatch vs reference"

    print("KERNEL_OK")
</pallas_src>

<mosaic_0001>
module attributes {stable_mosaic.version = 11 : i64} {
  func.func @_self_attention_kernel(%arg0: i32, %arg1: i32, %arg2: memref<8x32xbf16, #tpu.memory_space<vmem>>, %arg3: memref<8x32xbf16, #tpu.memory_space<vmem>>, %arg4: memref<8x32xbf16, #tpu.memory_space<vmem>>, %arg5: memref<4x32x8xbf16, #tpu.memory_space<vmem>>, %arg6: memref<4x32x8xbf16, #tpu.memory_space<vmem>>, %arg7: memref<4x32x8xbf16, #tpu.memory_space<vmem>>, %arg8: memref<4x8x32xbf16, #tpu.memory_space<vmem>>, %arg9: memref<1x32xf32, #tpu.memory_space<vmem>>, %arg10: memref<8x32xf32, #tpu.memory_space<vmem>>) attributes {dimension_semantics = [#tpu.dimension_semantics<parallel>, #tpu.dimension_semantics<arbitrary>], iteration_bounds = array<i64: 2, 4>, scalar_prefetch = 0 : i64, scratch_operands = 0 : i64, tpu.core_type = #tpu.core_type<tc>, window_params = [{transform_indices = @transform_0, window_bounds = array<i64: 8, 32>}, {transform_indices = @transform_1, window_bounds = array<i64: 8, 32>}, {transform_indices = @transform_2, window_bounds = array<i64: 8, 32>}, {pipeline_mode = #tpu.pipeline_mode<synchronous>, transform_indices = @transform_3, window_bounds = array<i64: 4, 32, 8>}, {pipeline_mode = #tpu.pipeline_mode<synchronous>, transform_indices = @transform_4, window_bounds = array<i64: 4, 32, 8>}, {pipeline_mode = #tpu.pipeline_mode<synchronous>, transform_indices = @transform_5, window_bounds = array<i64: 4, 32, 8>}, {pipeline_mode = #tpu.pipeline_mode<synchronous>, transform_indices = @transform_6, window_bounds = array<i64: 4, 8, 32>}, {pipeline_mode = #tpu.pipeline_mode<synchronous>, transform_indices = @transform_7, window_bounds = array<i64: 1, 32>}, {transform_indices = @transform_8, window_bounds = array<i64: 8, 32>}]} {
    %0 = arith.index_cast %arg1 : i32 to index
    %c0 = arith.constant 0 : index
    %c0_0 = arith.constant 0 : index
    %1 = vector.load %arg7[%0, %c0, %c0_0] : memref<4x32x8xbf16, #tpu.memory_space<vmem>>, vector<1x32x8xbf16>
    %2 = vector.shape_cast %1 : vector<1x32x8xbf16> to vector<32x8xbf16>
    %3 = arith.index_cast %arg1 : i32 to index
    %c0_1 = arith.constant 0 : index
    %c0_2 = arith.constant 0 : index
    %4 = vector.load %arg6[%3, %c0_1, %c0_2] : memref<4x32x8xbf16, #tpu.memory_space<vmem>>, vector<1x32x8xbf16>
    %5 = vector.shape_cast %4 : vector<1x32x8xbf16> to vector<32x8xbf16>
    %6 = arith.index_cast %arg1 : i32 to index
    %c0_3 = arith.constant 0 : index
    %c0_4 = arith.constant 0 : index
    %7 = vector.load %arg5[%6, %c0_3, %c0_4] : memref<4x32x8xbf16, #tpu.memory_space<vmem>>, vector<1x32x8xbf16>
    %8 = vector.shape_cast %7 : vector<1x32x8xbf16> to vector<32x8xbf16>
    %9 = arith.index_cast %arg1 : i32 to index
    %c0_5 = arith.constant 0 : index
    %c0_6 = arith.constant 0 : index
    %10 = vector.load %arg8[%9, %c0_5, %c0_6] : memref<4x8x32xbf16, #tpu.memory_space<vmem>>, vector<1x8x32xbf16>
    %11 = vector.shape_cast %10 : vector<1x8x32xbf16> to vector<8x32xbf16>
    %c0_7 = arith.constant 0 : index
    %c0_8 = arith.constant 0 : index
    %12 = vector.load %arg4[%c0_7, %c0_8] : memref<8x32xbf16, #tpu.memory_space<vmem>>, vector<8x32xbf16>
    %cst = arith.constant dense<0.000000e+00> : vector<8x8xf32>
    %13 = tpu.matmul %12, %2, %cst {dimension_numbers = #tpu.dot_dimension_numbers<[1], [0], [0], [1], [0, 0, 1, 1], [], []>} : vector<8x32xbf16>, vector<32x8xbf16>, vector<8x8xf32> -> vector<8x8xf32>
    %c0_9 = arith.constant 0 : index
    %c0_10 = arith.constant 0 : index
    %14 = vector.load %arg3[%c0_9, %c0_10] : memref<8x32xbf16, #tpu.memory_space<vmem>>, vector<8x32xbf16>
    %cst_11 = arith.constant dense<0.000000e+00> : vector<8x8xf32>
    %15 = tpu.matmul %14, %5, %cst_11 {dimension_numbers = #tpu.dot_dimension_numbers<[1], [0], [0], [1], [0, 0, 1, 1], [], []>} : vector<8x32xbf16>, vector<32x8xbf16>, vector<8x8xf32> -> vector<8x8xf32>
    %c0_12 = arith.constant 0 : index
    %c0_13 = arith.constant 0 : index
    %16 = vector.load %arg2[%c0_12, %c0_13] : memref<8x32xbf16, #tpu.memory_space<vmem>>, vector<8x32xbf16>
    %cst_14 = arith.constant dense<0.000000e+00> : vector<8x8xf32>
    %17 = tpu.matmul %16, %8, %cst_14 {dimension_numbers = #tpu.dot_dimension_numbers<[1], [0], [0], [1], [0, 0, 1, 1], [], []>} : vector<8x32xbf16>, vector<32x8xbf16>, vector<8x8xf32> -> vector<8x8xf32>
    %18 = arith.truncf %13 : vector<8x8xf32> to vector<8x8xbf16>
    %19 = vector.shape_cast %18 : vector<8x8xbf16> to vector<1x8x8xbf16>
    %20 = arith.truncf %15 : vector<8x8xf32> to vector<8x8xbf16>
    %21 = vector.shape_cast %20 : vector<8x8xbf16> to vector<1x8x8xbf16>
    %22 = arith.truncf %17 : vector<8x8xf32> to vector<8x8xbf16>
    %23 = vector.shape_cast %22 : vector<8x8xbf16> to vector<1x8x8xbf16>
    "tpu.trace_start"() <{level = 10 : i32, message = "bqd,bkd->bqk"}> : () -> ()
    %cst_15 = arith.constant dense<0.000000e+00> : vector<1x8x8xf32>
    %24 = tpu.matmul %19, %21, %cst_15 {dimension_numbers = #tpu.dot_dimension_numbers<[2], [2], [1], [1], [0, 0, 0, 1, 1, 1], [0], [0]>} : vector<1x8x8xbf16>, vector<1x8x8xbf16>, vector<1x8x8xf32> -> vector<1x8x8xf32>
    "tpu.trace_stop"() : () -> ()
    %cst_16 = arith.constant dense<0xFF800000> : vector<1x8xf32>
    %25 = vector.multi_reduction <maximumf>, %24, %cst_16 [2] : vector<1x8x8xf32> to vector<1x8xf32>
    %26 = vector.shape_cast %25 : vector<1x8xf32> to vector<1x8x1xf32>
    %27 = vector.broadcast %26 : vector<1x8x1xf32> to vector<1x8x8xf32>
    %28 = arith.subf %24, %27 : vector<1x8x8xf32>
    %29 = math.exp %28 : vector<1x8x8xf32>
    %cst_17 = arith.constant dense<0.000000e+00> : vector<1x8xf32>
    %30 = vector.multi_reduction <add>, %29, %cst_17 [2] : vector<1x8x8xf32> to vector<1x8xf32>
    %31 = vector.shape_cast %30 : vector<1x8xf32> to vector<1x8x1xf32>
    %32 = tpu.reciprocal %31 {approx = true} : vector<1x8x1xf32> -> vector<1x8x1xf32>
    %33 = vector.broadcast %32 : vector<1x8x1xf32> to vector<1x8x8xf32>
    %34 = arith.mulf %29, %33 : vector<1x8x8xf32>
    %35 = arith.truncf %34 : vector<1x8x8xf32> to vector<1x8x8xbf16>
    "tpu.trace_start"() <{level = 10 : i32, message = "bqk,bkd->bqd"}> : () -> ()
    %cst_18 = arith.constant dense<0.000000e+00> : vector<1x8x8xf32>
    %36 = tpu.matmul %35, %23, %cst_18 {dimension_numbers = #tpu.dot_dimension_numbers<[2], [1], [1], [2], [0, 0, 0, 1, 1, 2], [0], [0]>} : vector<1x8x8xbf16>, vector<1x8x8xbf16>, vector<1x8x8xf32> -> vector<1x8x8xf32>
    "tpu.trace_stop"() : () -> ()
    %37 = arith.truncf %36 : vector<1x8x8xf32> to vector<1x8x8xbf16>
    %38 = vector.shape_cast %37 : vector<1x8x8xbf16> to vector<8x8xbf16>
    %cst_19 = arith.constant dense<0.000000e+00> : vector<8x32xf32>
    %39 = tpu.matmul %38, %11, %cst_19 {dimension_numbers = #tpu.dot_dimension_numbers<[1], [0], [0], [1], [0, 0, 1, 1], [], []>} : vector<8x8xbf16>, vector<8x32xbf16>, vector<8x32xf32> -> vector<8x32xf32>
    %c0_i32 = arith.constant 0 : i32
    %40 = arith.cmpi eq, %arg1, %c0_i32 : i32
    %41 = arith.extui %40 : i1 to i32
    %c0_i32_20 = arith.constant 0 : i32
    %42 = arith.cmpi ne, %41, %c0_i32_20 : i32
    scf.if %42 {
      %c0_23 = arith.constant 0 : index
      %c0_24 = arith.constant 0 : index
      %46 = vector.load %arg9[%c0_23, %c0_24] : memref<1x32xf32, #tpu.memory_space<vmem>>, vector<1x32xf32>
      %47 = vector.broadcast %46 : vector<1x32xf32> to vector<8x32xf32>
      %48 = arith.addf %39, %47 : vector<8x32xf32>
      %c0_25 = arith.constant 0 : index
      %c0_26 = arith.constant 0 : index
      %49 = vector.load %arg10[%c0_25, %c0_26] : memref<8x32xf32, #tpu.memory_space<vmem>>, vector<8x32xf32>
      tpu.vector_store %arg10[%c0_25, %c0_26], %48 {strides = array<i32>} : memref<8x32xf32, #tpu.memory_space<vmem>>, vector<8x32xf32>,
    } else {
    }
    %c0_i32_21 = arith.constant 0 : i32
    %43 = arith.cmpi ne, %arg1, %c0_i32_21 : i32
    %44 = arith.extui %43 : i1 to i32
    %c0_i32_22 = arith.constant 0 : i32
    %45 = arith.cmpi ne, %44, %c0_i32_22 : i32
    scf.if %45 {
      %c0_23 = arith.constant 0 : index
      %c0_24 = arith.constant 0 : index
      %46 = vector.load %arg10[%c0_23, %c0_24] : memref<8x32xf32, #tpu.memory_space<vmem>>, vector<8x32xf32>
      %47 = arith.addf %46, %39 : vector<8x32xf32>
      %c0_25 = arith.constant 0 : index
      %c0_26 = arith.constant 0 : index
      %48 = vector.load %arg10[%c0_25, %c0_26] : memref<8x32xf32, #tpu.memory_space<vmem>>, vector<8x32xf32>
      tpu.vector_store %arg10[%c0_25, %c0_26], %47 {strides = array<i32>} : memref<8x32xf32, #tpu.memory_space<vmem>>, vector<8x32xf32>,
    } else {
    }
    return
  }
  func.func @transform_0(%arg0: i32, %arg1: i32) -> (i32, i32) {
    %c0_i32 = arith.constant 0 : i32
    %c0_i32_0 = arith.constant 0 : i32
    return %arg0, %c0_i32 : i32, i32
  }
  func.func @transform_1(%arg0: i32, %arg1: i32) -> (i32, i32) {
    %c0_i32 = arith.constant 0 : i32
    %c0_i32_0 = arith.constant 0 : i32
    return %arg0, %c0_i32 : i32, i32
  }
  func.func @transform_2(%arg0: i32, %arg1: i32) -> (i32, i32) {
    %c0_i32 = arith.constant 0 : i32
    %c0_i32_0 = arith.constant 0 : i32
    return %arg0, %c0_i32 : i32, i32
  }
  func.func @transform_3(%arg0: i32, %arg1: i32) -> (i32, i32, i32) {
    %c0_i32 = arith.constant 0 : i32
    %c0_i32_0 = arith.constant 0 : i32
    %c0_i32_1 = arith.constant 0 : i32
    %c0_i32_2 = arith.constant 0 : i32
    return %c0_i32, %c0_i32_0, %c0_i32_1 : i32, i32, i32
  }
  func.func @transform_4(%arg0: i32, %arg1: i32) -> (i32, i32, i32) {
    %c0_i32 = arith.constant 0 : i32
    %c0_i32_0 = arith.constant 0 : i32
    %c0_i32_1 = arith.constant 0 : i32
    %c0_i32_2 = arith.constant 0 : i32
    return %c0_i32, %c0_i32_0, %c0_i32_1 : i32, i32, i32
  }
  func.func @transform_5(%arg0: i32, %arg1: i32) -> (i32, i32, i32) {
    %c0_i32 = arith.constant 0 : i32
    %c0_i32_0 = arith.constant 0 : i32
    %c0_i32_1 = arith.constant 0 : i32
    %c0_i32_2 = arith.constant 0 : i32
    return %c0_i32, %c0_i32_0, %c0_i32_1 : i32, i32, i32
  }
  func.func @transform_6(%arg0: i32, %arg1: i32) -> (i32, i32, i32) {
    %c0_i32 = arith.constant 0 : i32
    %c0_i32_0 = arith.constant 0 : i32
    %c0_i32_1 = arith.constant 0 : i32
    %c0_i32_2 = arith.constant 0 : i32
    return %c0_i32, %c0_i32_0, %c0_i32_1 : i32, i32, i32
  }
  func.func @transform_7(%arg0: i32, %arg1: i32) -> (i32, i32) {
    %c0_i32 = arith.constant 0 : i32
    %c0_i32_0 = arith.constant 0 : i32
    %c0_i32_1 = arith.constant 0 : i32
    return %c0_i32, %c0_i32_0 : i32, i32
  }
  func.func @transform_8(%arg0: i32, %arg1: i32) -> (i32, i32) {
    %c0_i32 = arith.constant 0 : i32
    %c0_i32_0 = arith.constant 0 : i32
    return %arg0, %c0_i32 : i32, i32
  }
}

</mosaic_0001>

<bundles_post_ra>
// kernel: tpu_custom_call.1
= control target key start
LH: loop header
LB: loop body
LE: loop exit
PB: predicated region body
PF: predicated region fallthrough
CT: control target
= control target key end

     0   :  { %s1335_s0 = inlined_call_operand.vmem [shape: bf16[16,32], index: 0, kind: input, shape index: {}]   ;;  %s1336_s1 = inlined_call_operand.vmem [shape: bf16[16,32], index: 1, kind: input, shape index: {}]   ;;  %s1337_s2 = inlined_call_operand.vmem [shape: bf16[16,32], index: 2, kind: input, shape index: {}]   ;;  %s1338_s3 = inlined_call_operand.vmem [shape: bf16[4,32,8], index: 3, kind: input, shape index: {}]   ;;  %s1339_s4 = inlined_call_operand.vmem [shape: bf16[4,32,8], index: 4, kind: input, shape index: {}]   ;;  %s1340_s5 = inlined_call_operand.vmem [shape: bf16[4,32,8], index: 5, kind: input, shape index: {}]   ;;  %s1341_s6 = inlined_call_operand.vmem [shape: bf16[4,8,32], index: 6, kind: input, shape index: {}]   ;;  %s1342_s7 = inlined_call_operand.vmem [shape: f32[1,32], index: 7, kind: input, shape index: {}]   ;;  %s1343_s8 = inlined_call_operand.hbm [shape: f32[16,32], index: 8, kind: output, shape index: {}]  }
   0x1   :  { %1346 = sst [smem:[#allocation7_spill]] %s1339_s4 }
   0x2   :  { %1347 = sst [smem:[#allocation8_spill]] %s1340_s5 }
   0x3   :  { %13 = vsyncpa [#allocation3], 0 }
   0x4   :  { %15 = vsyncpa [#allocation3 + $0x1], 0  ;;  %s1151_s27 = smov 0   ;;  %s1153_s28 = smov 0  }
   0x5   :  { %s1155_s29 = smov 0   ;;  %s1157_s30 = smov 0  }
   0x6   :  { %s1159_s9 = smov 0   ;;  %s1161_s10 = smov 0  }
   0x7   :  { %s1163_s11 = smov 0   ;;  %s1165_s12 = smov 0  }
   0x8 LB: > { %s831_s13 = sadd.s32 4294967295, %s1101_s12   ;;  %s832_s14 = sadd.s32 4294967294, %s1101_s12   ;;  %s1101_s12 = sphi %s1165_s12, %s21_s12   ;;  %s1097_s11 = sphi %s1163_s11, %s1363_s11   ;;  %s1093_s10 = sphi %s1161_s10, %s1362_s10   ;;  %s1089_s9 = sphi %s1159_s9, %s1361_s9   ;;  %s1085_s30 = sphi %s1157_s30, %s1360_s30   ;;  %s1081_s29 = sphi %s1155_s29, %s1359_s29   ;;  %s1077_s28 = sphi %s1153_s28, %s1358_s28   ;;  %s1073_s27 = sphi %s1151_s27, %s1357_s27  }
   0x9   : > { %s30_s15 = sadd.s32 1, %s1093_s10  ;;  %s33_s16 = sadd.s32 1, %s1097_s11 }
   0xa   : > { %p31_p0 = scmp.ge.s32.totalorder %s30_s15, 4  ;;  %p233_p1 = scmp.ne.s32.totalorder %s1081_s29, %s1077_s28 }
   0xb   : > { %p234_p2 = scmp.eq.s32.totalorder %s831_s13, 7  ;;  %p239_p4 = scmp.ne.s32.totalorder %s1077_s28, %s1073_s27 }
   0xc   : > { %s1365_s15 = smov (%p31_p0, %s30_s15), 0  ;;  %s1367_s16 = smov (!%p31_p0, %s33_s16), %s1097_s11 }
   0xd   : > { %1348 = sst [smem:[#allocation5_spill]] %s1365_s15  ;;  %p1200_p3 = por %p234_p2, %p233_p1 }
   0xe   : > { %p35_p5 = scmp.ge.s32.totalorder %s1367_s16, 2  ;;  %p240_p6 = scmp.eq.s32.totalorder %s832_s14, 7 }
   0xf   : > { %p835_p7 = scmp.ge.s32.totalorder %s1101_s12, 1  ;;  %p294_p8 = scmp.lt.s32.totalorder %s1101_s12, 9 }
  0x10   : > { %s1369_s16 = smov (%p35_p5, %s1367_s16), 0  ;;  %p1210_p9 = por %p240_p6, %p239_p4 }
  0x11   : > { %1350 = sst [smem:[#allocation6_spill]] %s1369_s16  ;;  %p295_p10 = pnand %p835_p7, %p294_p8 }
  0x12   : > { %s220_s19 = ssub.s32 %s1097_s11, %s1369_s16  ;;  %s223_s20 = sadd.s32 1, %s1081_s29  ;;  %v1103_v0 = vmov (!%p295_p10), 0.0   ;;  %vm1104_vm0 = vmmov (!%p295_p10), 0   ;;  %vm383_vm1 = vcmask (!%p295_p10), 261120   ;;  %vm542_vm2 = vcmask (!%p295_p10), 64512  }
  0x13   : > { %p221_p11 = scmp.eq.s32.totalorder %s220_s19, 0  ;;  %298 = sbr.rel (%p295_p10) target bundleno = 1251 (0x4e3), region = 52  ;;  %890 = vmatprep.subr.bf16.mxu1 (!%p295_p10), %v1103_v0  ;;  %882 = vmatprep.subr.bf16.mxu0 (!%p295_p10), %v1103_v0  ;;  %vm604_vm3 = vcmask (!%p295_p10), 1043456  }
  0x14   : > { %s864_s22 = sshll.u32 (!%p295_p10), %s1085_s30, 4  ;;  %s1344_s23 = sand.u32 (!%p295_p10), 1, %s1077_s28   ;;  %894 = vmatprep.mubr.msk.bf16.mxu1 (!%p295_p10), %vm1104_vm0, %v1103_v0  ;;  %886 = vmatprep.mubr.msk.bf16.mxu0 (!%p295_p10), %vm1104_vm0, %v1103_v0 }
  0x15   : > { %s1218_s21 = scalar_select %p221_p11, %s1081_s29, %s223_s20  }
  0x16   : > { %s1352_s4 = sld [smem:[#allocation7_spill]] (!%p295_p10)  ;;  %s1227_s13 = sshll.u32 (!%p295_p10), %s1344_s23, 3 }
  0x17   : > { %s1353_s5 = sld [smem:[#allocation8_spill]] (!%p295_p10)  ;;  %p335_p12 = scmp.lt.s32.totalorder (!%p295_p10), %s1089_s9, 1 }
  0x18   : > { %s334_s25 = scalar_lea.vmem (!%p295_p10), [#allocation2], %s1227_s13  ;;  %p857_p13 = scmp.ne.s32.totalorder (!%p295_p10), %s1085_s30, 0 }
  0x1a   : > { %s336_s23 = scalar_select %p335_p12, %s1089_s9, 1 }
  0x1b   : > { %v858_v52 = vld [vmem:[%s1342_s7] ss:$0 sm:$0xff] (!%p857_p13) }
  0x1c   : > { %s356_s26 = scalar_lea.vmem %s1352_s4, %s864_s22  ;;  %s1238_s4 = scalar_lea.vmem %s1338_s3, %s864_s22 }
  0x1d   : > { %v997_v1 = vld [vmem:[%s356_s26] sm:$0xff]   ;;  %s350_s20 = scalar_lea.vmem %s1353_s5, %s864_s22  ;;  %v998_v2 = vld [vmem:[%s356_s26 + $0x8] sm:$0xff]   ;;  %s1241_s14 = sshll.u32 %s336_s23, 2 }
  0x1e   : > { %891 = vmatpush3.bf16.msra.mxu1 %v997_v1  ;;  %v999_v3 = vld [vmem:[%s350_s20] sm:$0xff]   ;;  %v1000_v4 = vld [vmem:[%s350_s20 + $0x8] sm:$0xff]   ;;  %s342_s5 = scalar_lea.vmem %s1336_s1, %s1241_s14  ;;  %s346_s22 = scalar_lea.vmem %s1337_s2, %s1241_s14 }
  0x1f   : > { %892 = vmatprep.subr.bf16.mxu1 %v1103_v0  ;;  %883 = vmatpush3.bf16.msra.mxu0 %v999_v3  ;;  %v427_v5 = vld [vmem:[%s342_s5] sm:$0xf]  ;;  %v1002_v19 = vld [vmem:[%s1238_s4 + $0x8] sm:$0xff]   ;;  %s338_s16 = scalar_lea.vmem %s1335_s0, %s1241_s14 }
  0x20   : > { %884 = vmatprep.subr.bf16.mxu0 %v1103_v0  ;;  %v370_v6 = vld [vmem:[%s346_s22] sm:$0xf] }
  0x21   : > { %v1001_v18 = vld [vmem:[%s1238_s4] sm:$0xff]   ;;  %s844_s4 = sshll.u32 %s1085_s30, 2 }
  0x22   : > { %893 = vmatpush3.bf16.msra.mxu1 %v998_v2  ;;  %v483_v20 = vld [vmem:[%s338_s16] sm:$0xf]  ;;  %s368_s24 = scalar_lea.vmem %s1341_s6, %s844_s4 }
  0x23   : > { %906 = vmatprep.subr.bf16.mxu1 %v1103_v0  ;;  %885 = vmatpush3.bf16.msra.mxu0 %v1000_v4  ;;  %v369_v37 = vld [vmem:[%s368_s24] sm:$0xf] }
  0x24   : > { %898 = vmatprep.subr.bf16.mxu0 %v1103_v0  ;;  %v653_v38 = vsel %vm604_vm3, %v369_v37, 0 }
  0x25   : > { %895 = vmatmul.mubr.msk.bf16.vlgmr.msra.gmra.mrb[0].mxu1 %vm383_vm1, %v427_v5 }
  0x26   : > { %908 = vmatprep.mubr.msk.bf16.mxu1 %vm1104_vm0, %v1103_v0  ;;  %887 = vmatmul.mubr.msk.bf16.vlgmr.msra.gmra.mrb[0].mxu0 %vm383_vm1, %v370_v6 }
  0x27   : > { %902 = vmatprep.mubr.msk.bf16.mxu0 %vm1104_vm0, %v1103_v0  ;;  %899 = vmatpush3.bf16.msra.mxu0 %v1001_v18 }
  0x28   : > { %900 = vmatprep.subr.bf16.mxu0 %v1103_v0 }
  0x2b   : > { %901 = vmatpush3.bf16.msra.mxu0 %v1002_v19 }
  0x2c   : > { %912 = vmatprep.subr.bf16.mxu0 %v1103_v0 }
  0x2e   : > { %903 = vmatmul.mubr.msk.bf16.vlgmr.msra.gmra.mrb[4].mxu0 %vm383_vm1, %v483_v20 }
  0x2f   : > { %914 = vmatprep.mubr.msk.bf16.mxu0 %vm1104_vm0, %v1103_v0 }
  0xf8   : > { %v477_v7 = vpop.f32.mrb[0].mxu1 }
  0xf9   : > { %v540_v8 = vpack.c.bf16 %v477_v7, %v477_v7  ;;  %v896_v9 = vpop.f32.mrb[1].mxu1  ;;  %v421_v11 = vpop.f32.mrb[0].mxu0 }
  0xfa   : > { %v480_v10 = vpop.f32.mrb[2].mxu1  ;;  %v888_v14 = vpop.f32.mrb[1].mxu0  ;;  %v539_v17 = vpack.c.bf16 %v421_v11, %v421_v11 }
  0xfb   : > { %v547_v12 = vsel %vm542_vm2, %v540_v8, 0  ;;  %v897_v13 = vpop.f32.mrb[3].mxu1  ;;  %v424_v15 = vpop.f32.mrb[2].mxu0 }
  0xfc   : > { %907 = vmatpush3.bf16.xpose.msra.mxu1 %v547_v12  ;;  %v889_v16 = vpop.f32.mrb[3].mxu0 }
  0xfd   : > { %918 = vmatprep.subr.bf16.mxu1 %v1103_v0 }
 0x101   : > { %v533_v31 = vpop.f32.mrb[4].mxu0 }
 0x102   : > { %v904_v32 = vpop.f32.mrb[5].mxu0  ;;  %v541_v35 = vpack.c.bf16 %v533_v31, %v533_v31 }
 0x103   : > { %909 = vmatmul.mubr.msk.bf16.vlgmr.msra.gmra.mrb[4].mxu1 %vm542_vm2, %v539_v17  ;;  %v536_v33 = vpop.f32.mrb[6].mxu0 }
 0x104   : > { %920 = vmatprep.mubr.msk.bf16.mxu1 %vm1104_vm0, %v1103_v0  ;;  %v905_v34 = vpop.f32.mrb[7].mxu0  ;;  %v606_v36 = vsel %vm604_vm3, %v541_v35, 0  ;;  %919 = vmatpush3.bf16.msra.mxu1 %v653_v38 }
 0x105   : > { %913 = vmatpush3.bf16.msra.mxu0 %v606_v36 }
 0x1d6   : > { %v583_v21 = vpop.f32.mrb[4].mxu1 }
 0x1d7   : > { %v910_v22 = vpop.f32.mrb[5].mxu1  ;;  %v589_v23 = vsel %vm542_vm2, %v583_v21, -inf }
 0x1d8   : > { %590 = vmax.xlane.f32.xlu0 %v589_v23  ;;  %v586_v24 = vpop.f32.mrb[6].mxu1 }
 0x1d9   : > { %v911_v25 = vpop.f32.mrb[7].mxu1 }
 0x265   : > { %v591_v26 = vpop.xlane.xlu0 %590 }
 0x266   : > { %v592_v27 = vsub.f32 %v583_v21, %v591_v26 }
 0x268   : > { %v593_v28 = vmul.f32 1.442695, %v592_v27 }
 0x26a   : > { %1003 = vpow2.f32 %v593_v28 }
 0x274   : > { %v1004_v29 = vpop.eup %1003 }
 0x275   : > { %v595_v30 = vsel %vm542_vm2, %v1004_v29, 0.0 }
 0x276   : > { %596 = vadd.xlane.f32.xlu0 %v595_v30 }
 0x303   : > { %v597_v39 = vpop.xlane.xlu0 %596 }
 0x304   : > { %1005 = vrcp.f32 %v597_v39 }
 0x30e   : > { %v1006_v40 = vpop.eup %1005 }
 0x30f   : > { %v599_v41 = vmul.f32 %v1006_v40, %v1004_v29 }
 0x311   : > { %v600_v42 = vpack.c.bf16 %v599_v41, %v599_v41 }
 0x313   : > { %915 = vmatmul.mubr.msk.bf16.vlgmr.msra.gmra.mrb[8].mxu0 %vm542_vm2, %v600_v42 }
 0x3e6   : > { %v642_v43 = vpop.f32.mrb[8].mxu0 }
 0x3e7   : > { %v648_v44 = vpack.c.bf16 %v642_v43, %v642_v43  ;;  %v916_v45 = vpop.f32.mrb[9].mxu0 }
 0x3e8   : > { %v645_v46 = vpop.f32.mrb[10].mxu0 }
 0x3e9   : > { %v917_v47 = vpop.f32.mrb[11].mxu0  ;;  %921 = vmatmul.mubr.msk.bf16.vlgmr.msra.gmra.mrb[8].mxu1 %vm542_vm2, %v648_v44 }
 0x4b9   : > { %698 = sbr.rel (%p857_p13) target bundleno = 1216 (0x4c0), region = 56 }
 0x4bc   : > { %v689_v48 = vpop.f32.mrb[8].mxu1 }
 0x4bd   : > { %v922_v49 = vpop.f32.mrb[9].mxu1  ;;  %v706_v53 = vadd.f32 (!%p857_p13), %v858_v52, %v689_v48 }
 0x4be   : > { %v692_v50 = vpop.f32.mrb[10].mxu1 }
 0x4bf   : > { %v923_v51 = vpop.f32.mrb[11].mxu1  ;;  %707 = vst.msk [vmem:[%s334_s25] sm:$0xff] (!%p857_p13), %vm383_vm1, %v706_v53 }
 0x4c0 PF: > { %p859_p0 = scmp.eq.s32.totalorder %s1085_s30, 0 }
 0x4c2   : > { %711 = sbr.rel (%p859_p0) target bundleno = 1226 (0x4ca), region = 60 }
 0x4c6   : > { %v712_v54 = vld [vmem:[%s334_s25] sm:$0xff] (!%p859_p0) }
 0x4c7   : > { %v713_v55 = vadd.f32 (!%p859_p0), %v712_v54, %v689_v48 }
 0x4c9   : > { %714 = vst.msk [vmem:[%s334_s25] sm:$0xff] %vm383_vm1, %v713_v55 }
 0x4ca PF: > { %s861_s13 = sshll.u32 %s1089_s9, 7  ;;  %s729_s15 = sshll.u32 %s334_s25, 4  ;;  %s730_s15 = int_to_ptr.vmem [resolvable:$true] %s729_s15 }
 0x4cb   : > { %s1286_s5 = scalar_lea.hbm %s1343_s8, %s861_s13  ;;  %s1354_s16 = sand.u32 1, %s1077_s28  }
 0x4cc   : > { %s716_s4 = scalar_lea.sflag [#allocation3], %s1354_s16  ;;  %s1007_s30 = scalar_lea.vmem %s730_s15, 128 }
 0x4cd   : > { %p1008_p1 = scmp.ne.s32.totalorder %s730_s15, %s1007_s30  ;;  %s1105_s23 = smov [#allocation2]  }
 0x4ce   : > { %s1011_s20 = sshll.u32 %s1105_s23, 4  ;;  %s1012_s20 = int_to_ptr.vmem [resolvable:$false] %s1011_s20 }
 0x4cf   : > { %p1009_p2 = pnand %p1008_p1, %p1200_p3  ;;  %s1013_s24 = scalar_lea.vmem %s1012_s20, 256 }
 0x4d0   : > { %p1014_p5 = scmp.lt.s32.totalorder %s730_s15, %s1012_s20  ;;  %p1015_p6 = scmp.lt.s32.totalorder %s1013_s24, %s1007_s30 }
 0x4d1   : > { %p1010_p4 = pneg %p1009_p2 }
 0x4d2   : > { %p1016_p7 = por %p1015_p6, %p1014_p5 }
 0x4d4   : > { %p1017_p8 = pnand %p1016_p7, %p1010_p4 }
 0x4d6   : > { %1020 = shalt.err (!%p1017_p8)
}
 0x4d7   : > { %s1021_s9 = scalar_lea.hbm %s1286_s5, 128  ;;  %s1025_s26 = scalar_lea.hbm %s1343_s8, 256 }
 0x4d8   : > { %p1022_p10 = scmp.ne.s32.totalorder %s1286_s5, %s1021_s9  ;;  %p1026_p13 = scmp.lt.u32.totalorder %s1286_s5, %s1343_s8 }
 0x4d9   : > { %p1027_p0 = scmp.lt.u32.totalorder %s1025_s26, %s1021_s9  ;;  %p1029_p2 = scmp.lt.u32.totalorder %s1021_s9, %s1286_s5 }
 0x4da   : > { %p1023_p11 = pnand %p1022_p10, %p1200_p3 }
 0x4db   : > { %p1028_p1 = por %p1027_p0, %p1026_p13 }
 0x4dc   : > { %p1024_p12 = pneg %p1023_p11 }
 0x4dd   : > { %p1030_p4 = por %p1029_p2, %p1028_p1 }
 0x4df   : > { %p1031_p5 = pnand %p1030_p4, %p1024_p12 }
 0x4e1   : > { %1034 = shalt.err (!%p1031_p5)
}
 0x4e2   : > { %924 = dma.vmem_to_hbm [thread:$0]  (%p1200_p3), %s730_s15, 128, %s1286_s5, %s716_s4  }
 0x4e3 PF: > { %p930_p6 = scmp.ge.s32.totalorder %s1101_s12, 2  ;;  %s741_s22 = sand.u32 1, %s1073_s27  }
 0x4e4   : > { %s742_s16 = scalar_lea.sflag [#allocation3], %s741_s22 }
 0x4e5   : > { %p927_p7 = pnand %p930_p6, %p1210_p9 }
 0x4e7   : > { %1068 = dma.done.wait (!%p927_p7), %s742_s16, 128  }
 0x4e8   : > { %1070 = vsyncadd (!%p927_p7), %s742_s16, 4294967168  ;;  %s21_s12 = sadd.s32 1, %s1101_s12   ;;  %s1355_s17 = sld [smem:[#allocation5_spill]] }
 0x4e9   : > { %p18_p8 = scmp.ge.s32.totalorder %s21_s12, 10   ;;  %s1356_s5 = sld [smem:[#allocation6_spill]] }
 0x4ea   : > { %s1357_s27 = smov %s1077_s28  ;;  %s1358_s28 = smov %s1081_s29 }
 0x4eb   : > { %s1359_s29 = smov %s1218_s21  ;;  %s1360_s30 = smov %s1093_s10 }
 0x4ec   : > { %s1361_s9 = smov %s1097_s11  ;;  %20 = sbr.rel (!%p18_p8) target bundleno = 8 (0x8), region = 105 }
 0x4ee   : > { %s1362_s10 = smov %s1355_s17 }
 0x4ef   : > { %s1363_s11 = smov %s1356_s5 }
 0x4f3   :  { %747 = vsyncpa [#allocation3], 1 }
 0x4f4   :  { %749 = vsyncpa [#allocation3 + $0x1], 1 }

</bundles_post_ra>
